<compile_context>
chip_gen: v6e
topology: v6e:2x2x1
jax: 0.10.0
libtpu: 0.0.40
codegen_flags: <defaults>
</compile_context>

<pallas_src>
import functools

import jax
import jax.numpy as jnp
from jax.experimental import pallas as pl
from jax.experimental.pallas import tpu as pltpu

LANE = 128          # lane width (minor dim of the slab)
ACC_ROWS = 32       # accumulator height: 4 vregs -> 4 independent add chains
IGNORE_VALUE = -100.0


def _round_up(x, m):
    return ((x + m - 1) // m) * m


def _cdiv(a, b):
    return (a + b - 1) // b


def _chip_config():
    """Return (multi_core, max_row_tile) for the local TPU generation."""
    kind = ""
    try:
        kind = (jax.devices()[0].device_kind or "").lower()
    except Exception:
        pass
    if "v7" in kind:
        # 2 TensorCores/chip; 8192x128xf32 = 4 MiB per input block, 16 MiB
        # double-buffered -- fits the 32 MiB default scoped VMEM.
        return True, 8192
    # v5e / v6e: single TensorCore; 4096x128xf32 = 2 MiB per input block,
    # 8 MiB double-buffered -- fits v5e's 16 MiB default scoped VMEM.
    return False, 4096


def _masked_mse_kernel(pred_ref, tgt_ref, loss_ref, cnt_ref, *,
                       steps_per_slice, num_blocks, gate_tail):
    c = pl.program_id(0)   # slice (one per TensorCore on v7x)
    i = pl.program_id(1)   # reduction step within the slice

    @pl.when(i == 0)
    def _():
        loss_ref[...] = jnp.zeros_like(loss_ref)
        cnt_ref[...] = jnp.zeros_like(cnt_ref)

    def _accumulate():
        t = tgt_ref[...].astype(jnp.float32)
        p = pred_ref[...].astype(jnp.float32)
        mask = t != jnp.float32(IGNORE_VALUE)       # padding is -100 -> masked
        d = jnp.where(mask, p - t, jnp.float32(0.0))  # one select per element
        rows = d.shape[0]
        # Fold (rows, 128) into the (32, 128) accumulator: 4 independent
        # vreg-shaped VALU add chains, no cross-lane (XLU) work per step.
        loss_ref[...] += jnp.sum(
            (d * d).reshape(rows // ACC_ROWS, ACC_ROWS, LANE), axis=0)
        cnt_ref[...] += jnp.sum(
            mask.astype(jnp.float32).reshape(rows // ACC_ROWS, ACC_ROWS, LANE),
            axis=0)

    if gate_tail:
        # Past-the-end duplicate programs (uneven block split across slices)
        # re-read the last block but skip the accumulate entirely.
        pl.when(c * steps_per_slice + i < num_blocks)(_accumulate)
    else:
        _accumulate()


def custom_mse_loss(pred, target, *, num_slices=None, max_row_tile=None):
    """Masked MSE identical to CustomMSELoss.forward (scalar output)."""
    assert pred.shape == target.shape, "pred/target must have the same shape"

    p_flat = jnp.ravel(pred)      # native dtype: cast to f32 on-chip
    t_flat = jnp.ravel(target)
    n = p_flat.shape[0]
    if n == 0:
        return jnp.float32(jnp.nan)   # 0/0, same as the PyTorch reference

    multi_core, chip_row_tile = _chip_config()
    if max_row_tile is None:
        max_row_tile = chip_row_tile
    if num_slices is None:
        num_slices = 2 if multi_core else 1

    rows = _cdiv(n, LANE)
    row_tile = min(max_row_tile, _round_up(rows, ACC_ROWS))
    padded_rows = _round_up(rows, row_tile)
    padded_n = padded_rows * LANE

    # Pad the tail of `target` with IGNORE_VALUE so `t != -100` masks out the
    # padding in-kernel -- no per-element flat-index mask required.
    if padded_n != n:
        pad = padded_n - n
        p_flat = jnp.pad(p_flat, (0, pad))
        t_flat = jnp.pad(t_flat, (0, pad), constant_values=IGNORE_VALUE)

    p2d = p_flat.reshape(padded_rows, LANE)
    t2d = t_flat.reshape(padded_rows, LANE)

    num_blocks = padded_rows // row_tile
    num_slices = min(num_slices, num_blocks)
    steps_per_slice = _cdiv(num_blocks, num_slices)
    gate_tail = num_slices * steps_per_slice != num_blocks

    if gate_tail:
        # Clamp so past-the-end programs re-read the last real block (their
        # accumulate is skipped in-kernel); keeps every DMA in bounds.
        def in_map(c, i):
            return (jnp.minimum(c * steps_per_slice + i, num_blocks - 1), 0)
    else:
        def in_map(c, i):
            return (c * steps_per_slice + i, 0)

    def out_map(c, i):
        return (c, 0)

    if multi_core and num_slices > 1:
        # Genuinely shard the reduction across the two TensorCores (v7x).
        semantics = (pltpu.CORE_PARALLEL, pltpu.ARBITRARY)
    else:
        semantics = ("parallel", "arbitrary")

    kernel = functools.partial(_masked_mse_kernel,
                               steps_per_slice=steps_per_slice,
                               num_blocks=num_blocks,
                               gate_tail=gate_tail)

    loss_parts, cnt_parts = pl.pallas_call(
        kernel,
        out_shape=(
            jax.ShapeDtypeStruct((num_slices * ACC_ROWS, LANE), jnp.float32),
            jax.ShapeDtypeStruct((num_slices * ACC_ROWS, LANE), jnp.float32),
        ),
        grid_spec=pltpu.PrefetchScalarGridSpec(
            num_scalar_prefetch=0,
            grid=(num_slices, steps_per_slice),
            in_specs=[
                pl.BlockSpec((row_tile, LANE), in_map),
                pl.BlockSpec((row_tile, LANE), in_map),
            ],
            out_specs=(
                pl.BlockSpec((ACC_ROWS, LANE), out_map),
                pl.BlockSpec((ACC_ROWS, LANE), out_map),
            ),
        ),
        compiler_params=pltpu.CompilerParams(dimension_semantics=semantics),
    )(p2d, t2d)

    # Tiny final reduction (num_slices * 32 * 128 partials each) + divide.
    return jnp.sum(loss_parts) / jnp.sum(cnt_parts)


def _reference(pred, target):
    p = pred.astype(jnp.float32)
    t = target.astype(jnp.float32)
    mask = (t != jnp.float32(IGNORE_VALUE)).astype(jnp.float32)
    return jnp.sum((p - t) ** 2 * mask) / jnp.sum(mask)


if __name__ == "__main__":
    key = jax.random.PRNGKey(0)
    k1, k2, k3 = jax.random.split(key, 3)

    def make_case(k, shape, dtype, p_ignore):
        ka, kb, kc = jax.random.split(k, 3)
        pred = jax.random.normal(ka, shape, dtype=dtype)
        target = jax.random.normal(kb, shape, dtype=dtype)
        ignore = jax.random.bernoulli(kc, p=p_ignore, shape=shape)
        target = jnp.where(ignore, jnp.asarray(IGNORE_VALUE, dtype), target)
        return pred, target

    # 1) Dense-prediction style (B, C, H, W) = (2, 4, 16, 16), f32, one block.
    pred, target = make_case(k1, (2, 4, 16, 16), jnp.float32, 0.3)
    loss = jax.block_until_ready(custom_mse_loss(pred, target))
    ref = _reference(pred, target)
    assert jnp.allclose(loss, ref, rtol=1e-5, atol=1e-5), (loss, ref)

    # 2) Unaligned native-bf16 case exercising the -100 tail padding.
    pred2, target2 = make_case(k2, (3, 5, 7), jnp.bfloat16, 0.25)
    loss2 = jax.block_until_ready(custom_mse_loss(pred2, target2))
    ref2 = _reference(pred2, target2)
    assert jnp.allclose(loss2, ref2, rtol=1e-4, atol=1e-5), (loss2, ref2)

    # 3) Multi-block + uneven 2-slice split (exercises the index-map clamp and
    #    the pl.when tail gate) at a small shape via the tiling test hooks.
    pred3, target3 = make_case(k3, (6, 4, 32, 32), jnp.float32, 0.5)
    loss3 = jax.block_until_ready(
        custom_mse_loss(pred3, target3, num_slices=2, max_row_tile=64))
    ref3 = _reference(pred3, target3)
    assert jnp.allclose(loss3, ref3, rtol=1e-5, atol=1e-5), (loss3, ref3)

    print("KERNEL_OK")
</pallas_src>

<mosaic_0001>
module attributes {stable_mosaic.version = 11 : i64} {
  func.func @_masked_mse_kernel(%arg0: i32, %arg1: i32, %arg2: memref<32x128xf32, #tpu.memory_space<vmem>>, %arg3: memref<32x128xf32, #tpu.memory_space<vmem>>, %arg4: memref<32x128xf32, #tpu.memory_space<vmem>>, %arg5: memref<32x128xf32, #tpu.memory_space<vmem>>) attributes {dimension_semantics = [#tpu.dimension_semantics<parallel>, #tpu.dimension_semantics<arbitrary>], iteration_bounds = array<i64: 1, 1>, scalar_prefetch = 0 : i64, scratch_operands = 0 : i64, tpu.core_type = #tpu.core_type<tc>, window_params = [{transform_indices = @transform_0, window_bounds = array<i64: 32, 128>}, {transform_indices = @transform_1, window_bounds = array<i64: 32, 128>}, {transform_indices = @transform_2, window_bounds = array<i64: 32, 128>}, {transform_indices = @transform_3, window_bounds = array<i64: 32, 128>}]} {
    %c0_i32 = arith.constant 0 : i32
    %0 = arith.cmpi eq, %arg1, %c0_i32 : i32
    %1 = arith.extui %0 : i1 to i32
    %c0_i32_0 = arith.constant 0 : i32
    %2 = arith.cmpi ne, %1, %c0_i32_0 : i32
    scf.if %2 {
      %cst_15 = arith.constant 0.000000e+00 : f32
      %23 = vector.broadcast %cst_15 : f32 to vector<32x128xf32>
      %c0_16 = arith.constant 0 : index
      %c0_17 = arith.constant 0 : index
      %24 = vector.load %arg4[%c0_16, %c0_17] : memref<32x128xf32, #tpu.memory_space<vmem>>, vector<32x128xf32>
      tpu.vector_store %arg4[%c0_16, %c0_17], %23 {strides = array<i32>} : memref<32x128xf32, #tpu.memory_space<vmem>>, vector<32x128xf32>,
      %cst_18 = arith.constant 0.000000e+00 : f32
      %25 = vector.broadcast %cst_18 : f32 to vector<32x128xf32>
      %c0_19 = arith.constant 0 : index
      %c0_20 = arith.constant 0 : index
      %26 = vector.load %arg5[%c0_19, %c0_20] : memref<32x128xf32, #tpu.memory_space<vmem>>, vector<32x128xf32>
      tpu.vector_store %arg5[%c0_19, %c0_20], %25 {strides = array<i32>} : memref<32x128xf32, #tpu.memory_space<vmem>>, vector<32x128xf32>,
    } else {
    }
    %c0 = arith.constant 0 : index
    %c0_1 = arith.constant 0 : index
    %3 = vector.load %arg3[%c0, %c0_1] : memref<32x128xf32, #tpu.memory_space<vmem>>, vector<32x128xf32>
    %c0_2 = arith.constant 0 : index
    %c0_3 = arith.constant 0 : index
    %4 = vector.load %arg2[%c0_2, %c0_3] : memref<32x128xf32, #tpu.memory_space<vmem>>, vector<32x128xf32>
    %cst = arith.constant -1.000000e+02 : f32
    %5 = vector.broadcast %cst : f32 to vector<32x128xf32>
    %6 = arith.cmpf one, %3, %5 : vector<32x128xf32>
    %7 = arith.subf %4, %3 : vector<32x128xf32>
    %cst_4 = arith.constant 0.000000e+00 : f32
    %8 = vector.broadcast %cst_4 : f32 to vector<32x128xf32>
    %9 = arith.select %6, %7, %8 : vector<32x128xi1>, vector<32x128xf32>
    %c0_5 = arith.constant 0 : index
    %c0_6 = arith.constant 0 : index
    %10 = vector.load %arg4[%c0_5, %c0_6] : memref<32x128xf32, #tpu.memory_space<vmem>>, vector<32x128xf32>
    %11 = arith.mulf %9, %9 : vector<32x128xf32>
    %12 = vector.shape_cast %11 : vector<32x128xf32> to vector<1x32x128xf32>
    %cst_7 = arith.constant dense<0.000000e+00> : vector<32x128xf32>
    %13 = vector.multi_reduction <add>, %12, %cst_7 [0] : vector<1x32x128xf32> to vector<32x128xf32>
    %14 = arith.addf %10, %13 : vector<32x128xf32>
    %c0_8 = arith.constant 0 : index
    %c0_9 = arith.constant 0 : index
    %15 = vector.load %arg4[%c0_8, %c0_9] : memref<32x128xf32, #tpu.memory_space<vmem>>, vector<32x128xf32>
    tpu.vector_store %arg4[%c0_8, %c0_9], %14 {strides = array<i32>} : memref<32x128xf32, #tpu.memory_space<vmem>>, vector<32x128xf32>,
    %c0_10 = arith.constant 0 : index
    %c0_11 = arith.constant 0 : index
    %16 = vector.load %arg5[%c0_10, %c0_11] : memref<32x128xf32, #tpu.memory_space<vmem>>, vector<32x128xf32>
    %17 = arith.extui %6 : vector<32x128xi1> to vector<32x128xi32>
    %18 = arith.sitofp %17 : vector<32x128xi32> to vector<32x128xf32>
    %19 = vector.shape_cast %18 : vector<32x128xf32> to vector<1x32x128xf32>
    %cst_12 = arith.constant dense<0.000000e+00> : vector<32x128xf32>
    %20 = vector.multi_reduction <add>, %19, %cst_12 [0] : vector<1x32x128xf32> to vector<32x128xf32>
    %21 = arith.addf %16, %20 : vector<32x128xf32>
    %c0_13 = arith.constant 0 : index
    %c0_14 = arith.constant 0 : index
    %22 = vector.load %arg5[%c0_13, %c0_14] : memref<32x128xf32, #tpu.memory_space<vmem>>, vector<32x128xf32>
    tpu.vector_store %arg5[%c0_13, %c0_14], %21 {strides = array<i32>} : memref<32x128xf32, #tpu.memory_space<vmem>>, vector<32x128xf32>,
    return
  }
  func.func @transform_0(%arg0: i32, %arg1: i32) -> (i32, i32) {
    %c1_i32 = arith.constant 1 : i32
    %0 = arith.muli %arg0, %c1_i32 : i32
    %1 = arith.addi %0, %arg1 : i32
    %c0_i32 = arith.constant 0 : i32
    %c0_i32_0 = arith.constant 0 : i32
    return %1, %c0_i32 : i32, i32
  }
  func.func @transform_1(%arg0: i32, %arg1: i32) -> (i32, i32) {
    %c1_i32 = arith.constant 1 : i32
    %0 = arith.muli %arg0, %c1_i32 : i32
    %1 = arith.addi %0, %arg1 : i32
    %c0_i32 = arith.constant 0 : i32
    %c0_i32_0 = arith.constant 0 : i32
    return %1, %c0_i32 : i32, i32
  }
  func.func @transform_2(%arg0: i32, %arg1: i32) -> (i32, i32) {
    %c0_i32 = arith.constant 0 : i32
    %c0_i32_0 = arith.constant 0 : i32
    return %arg0, %c0_i32 : i32, i32
  }
  func.func @transform_3(%arg0: i32, %arg1: i32) -> (i32, i32) {
    %c0_i32 = arith.constant 0 : i32
    %c0_i32_0 = arith.constant 0 : i32
    return %arg0, %c0_i32 : i32, i32
  }
}

</mosaic_0001>

<bundles_post_ra>
// kernel: tpu_custom_call.1
= control target key start
LH: loop header
LB: loop body
LE: loop exit
PB: predicated region body
PF: predicated region fallthrough
CT: control target
= control target key end

     0   :  { %9 = vsyncpa [#allocation3], 0  ;;  %s321_s0 = inlined_call_operand.hbm [shape: f32[32,128], index: 0, kind: input, shape index: {}]   ;;  %s322_s1 = inlined_call_operand.hbm [shape: f32[32,128], index: 1, kind: input, shape index: {}]   ;;  %s323_s2 = inlined_call_operand.hbm [shape: f32[32,128], index: 2, kind: output, shape index: {0}]   ;;  %s324_s3 = inlined_call_operand.hbm [shape: f32[32,128], index: 3, kind: output, shape index: {1}]  }
   0x1   :  { %10 = vsyncpa [#allocation6], 0 }
   0x2   :  { %11 = vsyncpa [#allocation4], 0 }
   0x3   :  { %12 = vsyncpa [#allocation9], 0  ;;  %s264_s12 = smov [#allocation2]  }
   0x4   :  { %s22_s13 = sshll.u32 %s264_s12, 4  ;;  %s23_s13 = int_to_ptr.vmem [resolvable:$true] %s22_s13 }
   0x5   :  { %s184_s14 = scalar_lea.vmem %s23_s13, 512  ;;  %p189_p1 = scmp.lt.s32.totalorder %s23_s13, %s23_s13 }
   0x6   :  { %p185_p0 = scmp.ne.s32.totalorder %s23_s13, %s184_s14  ;;  %p190_p2 = scmp.lt.s32.totalorder %s184_s14, %s184_s14 }
   0x8   :  { %p191_p3 = por %p190_p2, %p189_p1 }
   0xa   :  { %p192_p4 = pnand %p191_p3, %p185_p0 }
   0xc   :  { %195 = shalt.err (!%p192_p4)
}
   0xd   :  { %s265_s15 = smov 128   ;;  %s266_s16 = smov 8  }
   0xe   :  { %28 = dma.hbm_to_vmem [thread:$0]  %s321_s0, 512, %s23_s13, [#allocation3], %s265_s15, %s265_s15, %s266_s16  }
   0xf   :  { %s267_s19 = smov [#allocation5]  }
  0x10   :  { %s38_s20 = sshll.u32 %s267_s19, 4  ;;  %s39_s20 = int_to_ptr.vmem [resolvable:$true] %s38_s20 }
  0x11   :  { %s204_s21 = scalar_lea.vmem %s39_s20, 512  ;;  %p209_p6 = scmp.lt.s32.totalorder %s39_s20, %s39_s20 }
  0x12   :  { %p205_p5 = scmp.ne.s32.totalorder %s39_s20, %s204_s21  ;;  %p210_p7 = scmp.lt.s32.totalorder %s204_s21, %s204_s21 }
  0x14   :  { %p211_p8 = por %p210_p7, %p209_p6 }
  0x16   :  { %p212_p9 = pnand %p211_p8, %p205_p5 }
  0x18   :  { %215 = shalt.err (!%p212_p9)
}
  0x19   :  { %44 = dma.hbm_to_vmem [thread:$0]  %s322_s1, 512, %s39_s20, [#allocation6], %s265_s15, %s265_s15, %s266_s16  }
  0x1a   :  { %256 = dma.done.wait [#allocation3], 512  }
  0x1b   :  { %257 = vsyncadd [#allocation3], 4294966784 }
  0x1c   :  { %258 = dma.done.wait [#allocation6], 512  }
  0x1d   :  { %259 = vsyncadd [#allocation6], 4294966784  ;;  %v67_v0 = vld [vmem:[#allocation5] sm:$0xff]  ;;  %v68_v2 = vld [vmem:[#allocation5 + $0x8] sm:$0xff]  ;;  %v268_v11 = vmov 0.0   ;;  %s269_s0 = smov [#allocation8]  }
  0x1e   :  { %v71_v1 = vld [vmem:[#allocation2] sm:$0xff]  ;;  %vm75_vm0 = vcmp.ne.f32.partialorder %v67_v0, -100.0  ;;  %v72_v4 = vld [vmem:[#allocation2 + $0x8] sm:$0xff]  ;;  %vm76_vm1 = vcmp.ne.f32.partialorder %v68_v2, -100.0  ;;  %v69_v5 = vld [vmem:[#allocation5 + $0x10] sm:$0xff]  ;;  %s148_s1 = sshll.u32 %s269_s0, 4  ;;  %s149_s1 = int_to_ptr.vmem [resolvable:$true] %s148_s1 }
  0x1f   :  { %v79_v3 = vsub.f32 %v71_v1, %v67_v0  ;;  %v73_v6 = vld [vmem:[#allocation2 + $0x10] sm:$0xff]  ;;  %v80_v7 = vsub.f32 %v72_v4, %v68_v2  ;;  %vm77_vm2 = vcmp.ne.f32.partialorder %v69_v5, -100.0  ;;  %v70_v9 = vld [vmem:[#allocation5 + $0x18] sm:$0xff]  ;;  %v165_v12 = vsel %vm75_vm0, 1.0, %v268_v11  ;;  %s270_s24 = smov [#allocation7]   ;;  %s216_s26 = scalar_lea.vmem %s149_s1, 512 }
  0x20   :  { %v81_v8 = vsub.f32 %v73_v6, %v69_v5  ;;  %v74_v10 = vld [vmem:[#allocation2 + $0x18] sm:$0xff]  ;;  %vm78_vm3 = vcmp.ne.f32.partialorder %v70_v9, -100.0  ;;  %v166_v18 = vsel %vm76_vm1, 1.0, %v268_v11  ;;  %127 = vst [vmem:[#allocation8] sm:$0xff] %v165_v12  ;;  %s136_s25 = sshll.u32 %s270_s24, 4  ;;  %v167_v23 = vsel %vm77_vm2, 1.0, %v268_v11  ;;  %p217_p10 = scmp.ne.s32.totalorder %s149_s1, %s216_s26  ;;  %s137_s25 = int_to_ptr.vmem [resolvable:$true] %s136_s25 }
  0x21   :  { %v83_v13 = vsel %vm75_vm0, %v79_v3, 0.0  ;;  %v82_v14 = vsub.f32 %v74_v10, %v70_v9  ;;  %v84_v16 = vsel %vm76_vm1, %v80_v7, 0.0  ;;  %v168_v24 = vsel %vm78_vm3, 1.0, %v268_v11  ;;  %128 = vst [vmem:[#allocation8 + $0x8] sm:$0xff] %v166_v18  ;;  %129 = vst [vmem:[#allocation8 + $0x10] sm:$0xff] %v167_v23  ;;  %p221_p11 = scmp.lt.s32.totalorder %s149_s1, %s149_s1  ;;  %p222_p12 = scmp.lt.s32.totalorder %s216_s26, %s216_s26 }
  0x22   :  { %v91_v15 = vmul.f32 %v83_v13, %v83_v13  ;;  %v85_v17 = vsel %vm77_vm2, %v81_v8, 0.0  ;;  %v92_v19 = vmul.f32 %v84_v16, %v84_v16  ;;  %130 = vst [vmem:[#allocation8 + $0x18] sm:$0xff] %v168_v24 }
  0x23   :  { %v93_v20 = vmul.f32 %v85_v17, %v85_v17  ;;  %v86_v21 = vsel %vm78_vm3, %v82_v14, 0.0  ;;  %p223_p13 = por %p222_p12, %p221_p11 }
  0x24   :  { %v94_v22 = vmul.f32 %v86_v21, %v86_v21  ;;  %103 = vst [vmem:[#allocation7] sm:$0xff] %v91_v15  ;;  %104 = vst [vmem:[#allocation7 + $0x8] sm:$0xff] %v92_v19 }
  0x25   :  { %105 = vst [vmem:[#allocation7 + $0x10] sm:$0xff] %v93_v20  ;;  %p224_p0 = pnand %p223_p13, %p217_p10 }
  0x26   :  { %106 = vst [vmem:[#allocation7 + $0x18] sm:$0xff] %v94_v22 }
  0x27   :  { %227 = shalt.err (!%p224_p0)
}
  0x28   :  { %154 = dma.vmem_to_hbm [thread:$0]  %s149_s1, 512, %s324_s3, [#allocation9], %s265_s15, %s265_s15, %s266_s16  }
  0x29   :  { %s236_s29 = scalar_lea.vmem %s137_s25, 512  ;;  %p241_p2 = scmp.lt.s32.totalorder %s137_s25, %s137_s25 }
  0x2a   :  { %p237_p1 = scmp.ne.s32.totalorder %s137_s25, %s236_s29  ;;  %p242_p3 = scmp.lt.s32.totalorder %s236_s29, %s236_s29 }
  0x2c   :  { %p243_p4 = por %p242_p3, %p241_p2 }
  0x2e   :  { %p244_p5 = pnand %p243_p4, %p237_p1 }
  0x30   :  { %247 = shalt.err (!%p244_p5)
}
  0x31   :  { %142 = dma.vmem_to_hbm [thread:$0]  %s137_s25, 512, %s323_s2, [#allocation4], %s265_s15, %s265_s15, %s266_s16  }
  0x32   :  { %260 = dma.done.wait [#allocation4], 512  }
  0x33   :  { %261 = vsyncadd [#allocation4], 4294966784 }
  0x34   :  { %262 = dma.done.wait [#allocation9], 512  }
  0x35   :  { %263 = vsyncadd [#allocation9], 4294966784 }
  0x36   :  { %161 = vsyncpa [#allocation3], 1 }
  0x37   :  { %162 = vsyncpa [#allocation6], 1 }
  0x38   :  { %163 = vsyncpa [#allocation4], 1 }
  0x39   :  { %164 = vsyncpa [#allocation9], 1 }

</bundles_post_ra>
